<compile_context>
chip_gen: v6e
topology: v6e:2x2x1
jax: 0.10.0
libtpu: 0.0.40
codegen_flags: <defaults>
</compile_context>

<pallas_src>
import jax
import jax.numpy as jnp
from jax.experimental import pallas as pl
from jax.experimental.pallas import tpu as pltpu


# ---------------------------------------------------------------------------
# Kernels
# ---------------------------------------------------------------------------
def _concat_kernel(latent_ref, sym_ref, out_ref):
    """out = concat([latent, sym.float()], axis=1)  (per batch tile).

    The concat is materialized in registers first so the HBM writeback is a
    single dense store of the whole (TB, L+S) tile rather than a lane-offset
    masked store at column L.
    """
    out_ref[...] = jnp.concatenate(
        [latent_ref[...].astype(out_ref.dtype),
         sym_ref[...].astype(out_ref.dtype)],
        axis=1,
    )


def _gated_kernel(latent_ref, sym_ref, w_ref, b_ref, out_ref):
    """out = latent * sigmoid(sym.float() @ W + b)  (per batch tile)."""
    # Cast matches torch's `sym.float()`; if inputs arrive as bf16 the dot
    # could consume them directly (preferred_element_type keeps f32 accum),
    # but we keep the explicit f32 cast for exact semantic fidelity.
    sym = sym_ref[...].astype(jnp.float32)
    logits = jnp.dot(sym, w_ref[...], preferred_element_type=jnp.float32)
    logits = logits + b_ref[...]          # b_ref is [1, L]; broadcasts over rows
    gate = jax.nn.sigmoid(logits)         # exp lands on the EUP slot
    out_ref[...] = (latent_ref[...].astype(jnp.float32) * gate).astype(out_ref.dtype)


# ---------------------------------------------------------------------------
# Tiling / VMEM helpers
# ---------------------------------------------------------------------------
def _vmem_capacity_bytes() -> int:
    """Physical per-core VMEM; conservative (v7x) fallback if query fails."""
    try:
        return int(pltpu.get_tpu_info().vmem_capacity_bytes)
    except Exception:
        return 64 * 1024 * 1024


def _derive_batch_tile(B: int, row_bytes: int, resident_bytes: int,
                       vmem_cap: int) -> int:
    """Batch tile sized from a VMEM budget.

    Streamed tiles (latent/sym/out) are double-buffered by the Pallas pipeline,
    so the budget charges 2x per row; resident (weight/bias) bytes are charged
    at 2x as well in case the backend double-buffers them too.
    """
    budget = int(0.5 * vmem_cap) - 2 * resident_bytes
    tb = budget // (2 * row_bytes) if budget > 0 else 8
    tb = min(max(tb, 8), 4096)
    tb -= tb % 8                       # sublane multiple
    if B <= tb:
        if B >= 16:
            # Split into >=2 tiles so v7x's two TensorCores both get work
            # (no-op cost on single-TC v5e/v6e).
            half = -(-B // 2)
            tb = -(-half // 8) * 8
        else:
            tb = B                     # full-array block for tiny batches
    return max(tb, 1)


def _vmem_limit(needed_bytes: int, vmem_cap: int) -> int:
    """Generation-aware scoped-VMEM request: headroom, never all of VMEM."""
    return int(min(0.75 * vmem_cap, max(needed_bytes + (8 << 20), 32 << 20)))


# ---------------------------------------------------------------------------
# Wrappers
# ---------------------------------------------------------------------------
def symbolic_overlay_concat(latent, sym):
    B, L = latent.shape
    _, S = sym.shape
    cap = _vmem_capacity_bytes()
    row_bytes = 4 * 2 * (L + S)                     # latent+sym in, L+S out (f32)
    tb = _derive_batch_tile(B, row_bytes, 0, cap)
    grid = (pl.cdiv(B, tb),)
    needed = 2 * tb * row_bytes
    return pl.pallas_call(
        _concat_kernel,
        out_shape=jax.ShapeDtypeStruct((B, L + S), jnp.float32),
        grid=grid,
        in_specs=[
            pl.BlockSpec((tb, L), lambda i: (i, 0)),
            pl.BlockSpec((tb, S), lambda i: (i, 0)),
        ],
        out_specs=pl.BlockSpec((tb, L + S), lambda i: (i, 0)),
        compiler_params=pltpu.CompilerParams(
            dimension_semantics=("parallel",),
            vmem_limit_bytes=_vmem_limit(needed, cap),
        ),
    )(latent, sym)


def symbolic_overlay_gated(latent, sym, w, b2d):
    """w: [sym_dim, latent_dim] (transposed PyTorch weight), b2d: [1, latent_dim]."""
    B, L = latent.shape
    _, S = sym.shape
    cap = _vmem_capacity_bytes()
    row_bytes = 4 * (2 * L + S)                     # latent in + out + sym in (f32)
    resident = 4 * L * (S + 1)                      # W + bias
    # TODO(synk): if the weight alone approaches ~0.25 * VMEM (huge latent_dim on
    # v7x), a second grid axis tiling L (and W as (S, TL)) is needed.
    tb = _derive_batch_tile(B, row_bytes, resident, cap)
    grid = (pl.cdiv(B, tb),)
    needed = 2 * tb * row_bytes + 2 * resident
    params = pltpu.CompilerParams(
        dimension_semantics=("parallel",),
        vmem_limit_bytes=_vmem_limit(needed, cap),
    )

    def call(single_buffer_weights: bool):
        # W/b block indices never change; single-buffering them halves their
        # VMEM footprint (matters on v7x's 64 MiB).
        wkw = ({"pipeline_mode": pl.Buffered(1)} if single_buffer_weights else {})
        return pl.pallas_call(
            _gated_kernel,
            out_shape=jax.ShapeDtypeStruct((B, L), jnp.float32),
            grid=grid,
            in_specs=[
                pl.BlockSpec((tb, L), lambda i: (i, 0)),          # latent (streamed)
                pl.BlockSpec((tb, S), lambda i: (i, 0)),          # sym    (streamed)
                pl.BlockSpec((S, L), lambda i: (0, 0), **wkw),    # W: VMEM-resident
                pl.BlockSpec((1, L), lambda i: (0, 0), **wkw),    # b: VMEM-resident
            ],
            out_specs=pl.BlockSpec((tb, L), lambda i: (i, 0)),
            compiler_params=params,
        )(latent, sym, w, b2d)

    try:
        return call(True)
    except Exception:
        # Backend without pipeline_mode support: fall back to default buffering
        # (budget above already charged the weight at 2x, so tiling stays valid).
        return call(False)


class SymbolicOverlay:
    """JAX/Pallas port of the PyTorch SymbolicOverlay module."""

    def __init__(self, latent_dim: int, sym_dim: int, fusion_type: str = "concat",
                 key=None):
        assert fusion_type in {"concat", "gated"}
        self.latent_dim = latent_dim
        self.sym_dim = sym_dim
        self.fusion_type = fusion_type
        if fusion_type == "gated":
            if key is None:
                key = jax.random.PRNGKey(42)
            kw, kb = jax.random.split(key)
            # Deterministic init mimicking nn.Linear's uniform(-1/sqrt(in), 1/sqrt(in)).
            bound = 1.0 / (sym_dim ** 0.5)
            # PyTorch weight is [latent_dim, sym_dim]; store transposed [sym_dim, latent_dim].
            self.w = jax.random.uniform(kw, (sym_dim, latent_dim),
                                        minval=-bound, maxval=bound,
                                        dtype=jnp.float32)
            # Stored pre-reshaped to [1, L] so the wrapper does no per-call reshape.
            self.b = jax.random.uniform(kb, (1, latent_dim),
                                        minval=-bound, maxval=bound,
                                        dtype=jnp.float32)
            self._out_dim = latent_dim
        else:
            self.w = None
            self.b = None
            self._out_dim = latent_dim + sym_dim

    def __call__(self, latent, sym):
        # Output is f32, matching PyTorch's type promotion (gate / sym.float()
        # are f32, so cat / mul promote to f32 even for bf16 latents).
        if self.fusion_type == "concat":
            return symbolic_overlay_concat(latent, sym)
        return symbolic_overlay_gated(latent, sym, self.w, self.b)

    def get_output_dim(self) -> int:
        return self._out_dim


# ---------------------------------------------------------------------------
# Demo / self-check
# ---------------------------------------------------------------------------
if __name__ == "__main__":
    key = jax.random.PRNGKey(0)
    k_lat, k_sym, k_par = jax.random.split(key, 3)

    B, LATENT_DIM, SYM_DIM = 8, 32, 16
    latent = jax.random.normal(k_lat, (B, LATENT_DIM), dtype=jnp.float32)
    sym = jax.random.normal(k_sym, (B, SYM_DIM), dtype=jnp.float32)

    # --- concat fusion ---
    mod_concat = SymbolicOverlay(LATENT_DIM, SYM_DIM, "concat")
    out_concat = jax.block_until_ready(mod_concat(latent, sym))
    ref_concat = jnp.concatenate([latent, sym.astype(jnp.float32)], axis=1)
    assert out_concat.shape == (B, mod_concat.get_output_dim())
    assert jnp.allclose(out_concat, ref_concat, atol=1e-6), "concat mismatch"

    # --- gated fusion ---
    mod_gated = SymbolicOverlay(LATENT_DIM, SYM_DIM, "gated", key=k_par)
    out_gated = jax.block_until_ready(mod_gated(latent, sym))
    gate_ref = jax.nn.sigmoid(sym.astype(jnp.float32) @ mod_gated.w + mod_gated.b)
    ref_gated = latent * gate_ref
    assert out_gated.shape == (B, mod_gated.get_output_dim())
    assert jnp.allclose(out_gated, ref_gated, atol=1e-5), "gated mismatch"

    print("KERNEL_OK")
</pallas_src>

<mosaic_0001>
module attributes {stable_mosaic.version = 11 : i64} {
  func.func @_concat_kernel(%arg0: i32, %arg1: memref<8x32xf32, #tpu.memory_space<vmem>>, %arg2: memref<8x16xf32, #tpu.memory_space<vmem>>, %arg3: memref<8x48xf32, #tpu.memory_space<vmem>>) attributes {dimension_semantics = [#tpu.dimension_semantics<parallel>], iteration_bounds = array<i64: 1>, scalar_prefetch = 0 : i64, scratch_operands = 0 : i64, tpu.core_type = #tpu.core_type<tc>, window_params = [{transform_indices = @transform_0, window_bounds = array<i64: 8, 32>}, {transform_indices = @transform_1, window_bounds = array<i64: 8, 16>}, {transform_indices = @transform_2, window_bounds = array<i64: 8, 48>}]} {
    %c0 = arith.constant 0 : index
    %c0_0 = arith.constant 0 : index
    %0 = vector.load %arg1[%c0, %c0_0] : memref<8x32xf32, #tpu.memory_space<vmem>>, vector<8x32xf32>
    %c0_1 = arith.constant 0 : index
    %c0_2 = arith.constant 0 : index
    %1 = vector.load %arg2[%c0_1, %c0_2] : memref<8x16xf32, #tpu.memory_space<vmem>>, vector<8x16xf32>
    %2 = tpu.concatenate %0, %1 in 1 : vector<8x32xf32>, vector<8x16xf32> -> vector<8x48xf32>
    %c0_3 = arith.constant 0 : index
    %c0_4 = arith.constant 0 : index
    %3 = vector.load %arg3[%c0_3, %c0_4] : memref<8x48xf32, #tpu.memory_space<vmem>>, vector<8x48xf32>
    tpu.vector_store %arg3[%c0_3, %c0_4], %2 {strides = array<i32>} : memref<8x48xf32, #tpu.memory_space<vmem>>, vector<8x48xf32>,
    return
  }
  func.func @transform_0(%arg0: i32) -> (i32, i32) {
    %c0_i32 = arith.constant 0 : i32
    %c0_i32_0 = arith.constant 0 : i32
    return %arg0, %c0_i32 : i32, i32
  }
  func.func @transform_1(%arg0: i32) -> (i32, i32) {
    %c0_i32 = arith.constant 0 : i32
    %c0_i32_0 = arith.constant 0 : i32
    return %arg0, %c0_i32 : i32, i32
  }
  func.func @transform_2(%arg0: i32) -> (i32, i32) {
    %c0_i32 = arith.constant 0 : i32
    %c0_i32_0 = arith.constant 0 : i32
    return %arg0, %c0_i32 : i32, i32
  }
}

</mosaic_0001>

<bundles_post_ra>
// kernel: tpu_custom_call.1
= control target key start
LH: loop header
LB: loop body
LE: loop exit
PB: predicated region body
PF: predicated region fallthrough
CT: control target
= control target key end

     0   :  { %7 = vsyncpa [#allocation3], 0  ;;  %s160_s0 = inlined_call_operand.hbm [shape: f32[8,32], index: 0, kind: input, shape index: {}]   ;;  %s161_s1 = inlined_call_operand.hbm [shape: f32[8,16], index: 1, kind: input, shape index: {}]   ;;  %s162_s2 = inlined_call_operand.hbm [shape: f32[8,48], index: 2, kind: output, shape index: {}]  }
   0x1   :  { %8 = vsyncpa [#allocation6], 0 }
   0x2   :  { %9 = vsyncpa [#allocation4], 0  ;;  %s132_s9 = smov [#allocation2]   ;;  %s133_s11 = smov [#allocation5]  }
   0x3   :  { %s16_s10 = sshll.u32 %s132_s9, 4  ;;  %s26_s12 = sshll.u32 %s133_s11, 4  ;;  %s17_s10 = int_to_ptr.vmem [resolvable:$true] %s16_s10  ;;  %s27_s12 = int_to_ptr.vmem [resolvable:$true] %s26_s12 }
   0x4   :  { %s74_s13 = scalar_lea.vmem %s17_s10, 128  ;;  %p79_p1 = scmp.lt.s32.totalorder %s17_s10, %s17_s10 }
   0x5   :  { %p75_p0 = scmp.ne.s32.totalorder %s17_s10, %s74_s13  ;;  %p80_p2 = scmp.lt.s32.totalorder %s74_s13, %s74_s13 }
   0x7   :  { %p81_p3 = por %p80_p2, %p79_p1 }
   0x9   :  { %p82_p4 = pnand %p81_p3, %p75_p0 }
   0xb   :  { %85 = shalt.err (!%p82_p4)
}
   0xc   :  { %19 = dma.hbm_to_vmem [thread:$0]  %s160_s0, 128, %s17_s10, [#allocation3]  }
   0xd   :  { %s94_s16 = scalar_lea.vmem %s27_s12, 128  ;;  %p99_p6 = scmp.lt.s32.totalorder %s27_s12, %s27_s12 }
   0xe   :  { %p95_p5 = scmp.ne.s32.totalorder %s27_s12, %s94_s16  ;;  %p100_p7 = scmp.lt.s32.totalorder %s94_s16, %s94_s16 }
  0x10   :  { %p101_p8 = por %p100_p7, %p99_p6 }
  0x12   :  { %p102_p9 = pnand %p101_p8, %p95_p5 }
  0x14   :  { %105 = shalt.err (!%p102_p9)
}
  0x15   :  { %29 = dma.hbm_to_vmem [thread:$0]  %s161_s1, 128, %s27_s12, [#allocation6]  }
  0x16   :  { %126 = dma.done.wait [#allocation3], 128  }
  0x17   :  { %127 = vsyncadd [#allocation3], 4294967168 }
  0x18   :  { %128 = dma.done.wait [#allocation6], 128  }
  0x19   :  { %129 = vsyncadd [#allocation6], 4294967168  ;;  %v37_v0 = vld [vmem:[#allocation5] sm:$0xff]  ;;  %s134_s19 = smov 32   ;;  %s135_s20 = smov [#allocation7]   ;;  %v36_v1 = vld [vmem:[#allocation2] sm:$0xff] }
  0x1a   :  { %39 = vrot.lane.b32.xlu0 %v37_v0, %s134_s19  ;;  %s52_s0 = sshll.u32 %s135_s20, 4  ;;  %vm42_vm0 = vcmask 261120   ;;  %vm44_vm1 = vcmask 392192   ;;  %s53_s0 = int_to_ptr.vmem [resolvable:$true] %s52_s0 }
  0x1b   :  { %s106_s21 = scalar_lea.vmem %s53_s0, 128  ;;  %p111_p11 = scmp.lt.s32.totalorder %s53_s0, %s53_s0 }
  0x1c   :  { %p107_p10 = scmp.ne.s32.totalorder %s53_s0, %s106_s21  ;;  %p112_p12 = scmp.lt.s32.totalorder %s106_s21, %s106_s21 }
  0x1e   :  { %p113_p13 = por %p112_p12, %p111_p11 }
  0x20   :  { %p114_p0 = pnand %p113_p13, %p107_p10 }
  0x8c   :  { %v40_v2 = vpop.permute.xlu0 %39 }
  0x8d   :  { %v43_v3 = vsel %vm42_vm0, %v36_v1, %v40_v2 }
  0x8e   :  { %45 = vst.msk [vmem:[#allocation7] sm:$0xff] %vm44_vm1, %v43_v3 }
  0x8f   :  { %117 = shalt.err (!%p114_p0)
}
  0x90   :  { %55 = dma.vmem_to_hbm [thread:$0]  %s53_s0, 128, %s162_s2, [#allocation4]  }
  0x91   :  { %130 = dma.done.wait [#allocation4], 128  }
  0x92   :  { %131 = vsyncadd [#allocation4], 4294967168 }
  0x93   :  { %59 = vsyncpa [#allocation3], 1 }
  0x94   :  { %60 = vsyncpa [#allocation6], 1 }
  0x95   :  { %61 = vsyncpa [#allocation4], 1 }

</bundles_post_ra>
